<compile_context>
chip_gen: v7x
topology: tpu7x:2x2x1
jax: 0.10.0
libtpu: 0.0.40
codegen_flags: <defaults>
</compile_context>

<pallas_src>
import functools

import jax
import jax.numpy as jnp
from jax.experimental import pallas as pl
from jax.experimental.pallas import tpu as pltpu


def _resblock_kernel(x_ref, w_ref, b_ref, o_ref, *, use_mxu):
    # x_ref: (1, C, ts)  activation tile (channels on sublanes, spatial on lanes)
    # w_ref: (C, C)      conv weight, (C_out, C_in)
    # b_ref: (C, 1)      bias (broadcasts over lanes)
    # o_ref: (1, C, ts)
    x = x_ref[0]                                    # (C, ts)
    xf = x.astype(jnp.float32)
    bias = b_ref[...].astype(jnp.float32)           # (C, 1)

    if use_mxu:
        # MXU path: contract over C_in, accumulate in f32.
        y = jnp.dot(w_ref[...], x, preferred_element_type=jnp.float32)
    else:
        # VPU path for small C: C broadcast multiply-adds, no MXU and no
        # cross-lane movement (weight column broadcasts over lanes, input
        # row broadcasts over sublanes).  Static Python loop -> fully
        # unrolled, LLO can schedule it freely.
        wf = w_ref[...].astype(jnp.float32)         # (C_out, C_in)
        y = jnp.zeros_like(xf)
        for c in range(x.shape[0]):                 # static, unrolled
            y = y + wf[:, c:c + 1] * xf[c:c + 1, :]

    # Bias + residual in f32, single downcast at the end.
    o_ref[0] = (y + bias + xf).astype(o_ref.dtype)


def resblock_pointwise_conv(x_nchw, weight, bias, *, max_spatial_tile=4096):
    """ResBlock forward: Conv2d(C, C, 1)(x) + x, input/output in NCHW."""
    N, C, H, W = x_nchw.shape
    S = H * W

    # Free views (no data movement): NCHW -> [N, C, S]; (C,C,1,1) -> (C,C).
    x3 = x_nchw.reshape(N, C, S)
    w2 = weight.reshape(C, C)
    b2 = bias.reshape(C, 1)

    itemsize = jnp.dtype(x_nchw.dtype).itemsize

    # Spatial (lane) tile: multiple of 128 when possible, sized so the
    # double-buffered in+out activation tiles (4 tiles of C*ts) fit a
    # conservative 24 MiB budget -> safe on every generation's VMEM.
    if S >= 128:
        budget = 24 << 20
        ts_cap = max(128, ((budget // max(1, 4 * C * itemsize)) // 128) * 128)
        ts = min((S // 128) * 128, ts_cap, max_spatial_tile)
    else:
        ts = S                      # short spatial axis: full dim as one block
    grid = (N, pl.cdiv(S, ts))      # ragged last tile handled by Pallas masking

    use_mxu = C >= 32               # tiny C: VPU FMAs beat an idle MXU
    kernel = functools.partial(_resblock_kernel, use_mxu=use_mxu)

    # 2x double-buffered activation tile (in + out) + weight + bias + headroom.
    vmem_need = (4 * C * ts + 2 * C * C + 2 * C) * itemsize + (2 << 20)
    vmem_limit = int(min(max(2 * vmem_need, 32 << 20), 64 << 20))

    cost = pl.CostEstimate(
        flops=2 * N * C * C * S + 2 * N * C * S,
        transcendentals=0,
        bytes_accessed=(2 * N * C * S + C * C + C) * itemsize,
    )

    out3 = pl.pallas_call(
        kernel,
        out_shape=jax.ShapeDtypeStruct((N, C, S), x_nchw.dtype),
        grid_spec=pltpu.PrefetchScalarGridSpec(
            num_scalar_prefetch=0,
            grid=grid,
            in_specs=[
                # Activation: one batch, all channels, one lane-dense tile.
                pl.BlockSpec((1, C, ts), lambda n, s: (n, 0, s)),
                # Weight / bias: grid-invariant (fetched once, reused).
                pl.BlockSpec((C, C), lambda n, s: (0, 0)),
                pl.BlockSpec((C, 1), lambda n, s: (0, 0)),
            ],
            out_specs=pl.BlockSpec((1, C, ts), lambda n, s: (n, 0, s)),
        ),
        compiler_params=pltpu.CompilerParams(
            dimension_semantics=("parallel", "parallel"),
            vmem_limit_bytes=vmem_limit),
        cost_estimate=cost,
    )(x3, w2, b2)

    return out3.reshape(N, C, H, W)


if __name__ == "__main__":
    key = jax.random.PRNGKey(0)
    kx, kw, kb = jax.random.split(key, 3)

    N, C, H, W = 2, 4, 16, 16
    x = jax.random.normal(kx, (N, C, H, W), dtype=jnp.float32)
    # Deterministic synthetic parameters (shapes from Conv2d(C, C, 1)).
    weight = jax.random.normal(kw, (C, C, 1, 1), dtype=jnp.float32) * 0.1
    bias = jax.random.normal(kb, (C,), dtype=jnp.float32) * 0.1

    out = resblock_pointwise_conv(x, weight, bias)
    out = jax.block_until_ready(out)

    # Pure-JAX reference: 1x1 conv over channels + bias + residual, in NCHW.
    ref = (jnp.einsum("oc,nchw->nohw", weight.reshape(C, C), x)
           + bias.reshape(1, C, 1, 1) + x)
    assert out.shape == (N, C, H, W)
    assert jnp.allclose(out, ref, atol=1e-5, rtol=1e-5)

    print("KERNEL_OK")
</pallas_src>

<mosaic_0001>
module attributes {stable_mosaic.version = 11 : i64} {
  func.func @_resblock_kernel(%arg0: i32, %arg1: i32, %arg2: memref<1x4x256xf32, #tpu.memory_space<vmem>>, %arg3: memref<4x4xf32, #tpu.memory_space<vmem>>, %arg4: memref<4x1xf32, #tpu.memory_space<vmem>>, %arg5: memref<1x4x256xf32, #tpu.memory_space<vmem>>) attributes {dimension_semantics = [#tpu.dimension_semantics<parallel>, #tpu.dimension_semantics<parallel>], iteration_bounds = array<i64: 2, 1>, scalar_prefetch = 0 : i64, scratch_operands = 0 : i64, tpu.core_type = #tpu.core_type<tc>, window_params = [{transform_indices = @transform_0, window_bounds = array<i64: 1, 4, 256>}, {pipeline_mode = #tpu.pipeline_mode<synchronous>, transform_indices = @transform_1, window_bounds = array<i64: 4, 4>}, {pipeline_mode = #tpu.pipeline_mode<synchronous>, transform_indices = @transform_2, window_bounds = array<i64: 4, 1>}, {transform_indices = @transform_3, window_bounds = array<i64: 1, 4, 256>}]} {
    %c0 = arith.constant 0 : index
    %c0_0 = arith.constant 0 : index
    %c0_1 = arith.constant 0 : index
    %0 = vector.load %arg2[%c0, %c0_0, %c0_1] : memref<1x4x256xf32, #tpu.memory_space<vmem>>, vector<1x4x256xf32>
    %1 = vector.shape_cast %0 : vector<1x4x256xf32> to vector<4x256xf32>
    %c0_2 = arith.constant 0 : index
    %c0_3 = arith.constant 0 : index
    %2 = vector.load %arg4[%c0_2, %c0_3] : memref<4x1xf32, #tpu.memory_space<vmem>>, vector<4x1xf32>
    %c0_4 = arith.constant 0 : index
    %c0_5 = arith.constant 0 : index
    %3 = vector.load %arg3[%c0_4, %c0_5] : memref<4x4xf32, #tpu.memory_space<vmem>>, vector<4x4xf32>
    %cst = arith.constant 0.000000e+00 : f32
    %4 = vector.broadcast %cst : f32 to vector<4x256xf32>
    %5 = vector.extract_strided_slice %3 {offsets = [0, 0], sizes = [4, 1], strides = [1, 1]} : vector<4x4xf32> to vector<4x1xf32>
    %6 = vector.extract_strided_slice %1 {offsets = [0, 0], sizes = [1, 256], strides = [1, 1]} : vector<4x256xf32> to vector<1x256xf32>
    %7 = vector.broadcast %5 : vector<4x1xf32> to vector<4x256xf32>
    %8 = vector.broadcast %6 : vector<1x256xf32> to vector<4x256xf32>
    %9 = arith.mulf %7, %8 : vector<4x256xf32>
    %10 = arith.addf %4, %9 : vector<4x256xf32>
    %11 = vector.extract_strided_slice %3 {offsets = [0, 1], sizes = [4, 1], strides = [1, 1]} : vector<4x4xf32> to vector<4x1xf32>
    %12 = vector.extract_strided_slice %1 {offsets = [1, 0], sizes = [1, 256], strides = [1, 1]} : vector<4x256xf32> to vector<1x256xf32>
    %13 = vector.broadcast %11 : vector<4x1xf32> to vector<4x256xf32>
    %14 = vector.broadcast %12 : vector<1x256xf32> to vector<4x256xf32>
    %15 = arith.mulf %13, %14 : vector<4x256xf32>
    %16 = arith.addf %10, %15 : vector<4x256xf32>
    %17 = vector.extract_strided_slice %3 {offsets = [0, 2], sizes = [4, 1], strides = [1, 1]} : vector<4x4xf32> to vector<4x1xf32>
    %18 = vector.extract_strided_slice %1 {offsets = [2, 0], sizes = [1, 256], strides = [1, 1]} : vector<4x256xf32> to vector<1x256xf32>
    %19 = vector.broadcast %17 : vector<4x1xf32> to vector<4x256xf32>
    %20 = vector.broadcast %18 : vector<1x256xf32> to vector<4x256xf32>
    %21 = arith.mulf %19, %20 : vector<4x256xf32>
    %22 = arith.addf %16, %21 : vector<4x256xf32>
    %23 = vector.extract_strided_slice %3 {offsets = [0, 3], sizes = [4, 1], strides = [1, 1]} : vector<4x4xf32> to vector<4x1xf32>
    %24 = vector.extract_strided_slice %1 {offsets = [3, 0], sizes = [1, 256], strides = [1, 1]} : vector<4x256xf32> to vector<1x256xf32>
    %25 = vector.broadcast %23 : vector<4x1xf32> to vector<4x256xf32>
    %26 = vector.broadcast %24 : vector<1x256xf32> to vector<4x256xf32>
    %27 = arith.mulf %25, %26 : vector<4x256xf32>
    %28 = arith.addf %22, %27 : vector<4x256xf32>
    %29 = vector.broadcast %2 : vector<4x1xf32> to vector<4x256xf32>
    %30 = arith.addf %28, %29 : vector<4x256xf32>
    %31 = arith.addf %30, %1 : vector<4x256xf32>
    %c0_6 = arith.constant 0 : index
    %c0_7 = arith.constant 0 : index
    %c0_8 = arith.constant 0 : index
    %32 = vector.load %arg5[%c0_6, %c0_7, %c0_8] : memref<1x4x256xf32, #tpu.memory_space<vmem>>, vector<1x4x256xf32>
    %33 = vector.shape_cast %32 : vector<1x4x256xf32> to vector<4x256xf32>
    %34 = vector.shape_cast %31 : vector<4x256xf32> to vector<1x4x256xf32>
    tpu.vector_store %arg5[%c0_6, %c0_7, %c0_8], %34 {strides = array<i32>} : memref<1x4x256xf32, #tpu.memory_space<vmem>>, vector<1x4x256xf32>,
    return
  }
  func.func @transform_0(%arg0: i32, %arg1: i32) -> (i32, i32, i32) {
    %c0_i32 = arith.constant 0 : i32
    %c0_i32_0 = arith.constant 0 : i32
    return %arg0, %c0_i32, %arg1 : i32, i32, i32
  }
  func.func @transform_1(%arg0: i32, %arg1: i32) -> (i32, i32) {
    %c0_i32 = arith.constant 0 : i32
    %c0_i32_0 = arith.constant 0 : i32
    %c0_i32_1 = arith.constant 0 : i32
    return %c0_i32, %c0_i32_0 : i32, i32
  }
  func.func @transform_2(%arg0: i32, %arg1: i32) -> (i32, i32) {
    %c0_i32 = arith.constant 0 : i32
    %c0_i32_0 = arith.constant 0 : i32
    %c0_i32_1 = arith.constant 0 : i32
    return %c0_i32, %c0_i32_0 : i32, i32
  }
  func.func @transform_3(%arg0: i32, %arg1: i32) -> (i32, i32, i32) {
    %c0_i32 = arith.constant 0 : i32
    %c0_i32_0 = arith.constant 0 : i32
    return %arg0, %c0_i32, %arg1 : i32, i32, i32
  }
}

</mosaic_0001>

<bundles_post_ra>
// kernel: tpu_custom_call.1
= control target key start
LH: loop header
LB: loop body
LE: loop exit
PB: predicated region body
PF: predicated region fallthrough
CT: control target
= control target key end

     0   :  { %8 = vsyncpa [#allocation3], 0  ;;  %s845_s0 = inlined_call_operand.hbm [shape: f32[2,4,256], index: 0, kind: input, shape index: {}]   ;;  %s846_s1 = inlined_call_operand.vmem [shape: f32[4,4], index: 1, kind: input, shape index: {}]   ;;  %s847_s2 = inlined_call_operand.vmem [shape: f32[4,1], index: 2, kind: input, shape index: {}]   ;;  %s848_s3 = inlined_call_operand.hbm [shape: f32[2,4,256], index: 3, kind: output, shape index: {}]  }
   0x1   :  { %10 = vsyncpa [#allocation3 + $0x1], 0 }
   0x2   :  { %11 = vsyncpa [#allocation4], 0 }
   0x3   :  { %13 = vsyncpa [#allocation4 + $0x1], 0  ;;  %s663_s12 = smov 0   ;;  %s665_s13 = smov 0  }
   0x4   :  { %s667_s14 = smov 0   ;;  %s669_s15 = smov 0  }
   0x5   :  { %s671_s16 = smov 0   ;;  %s673_s17 = smov 0  }
   0x6 LB: > { %s433_s18 = sadd.s32 4294967295, %s635_s17   ;;  %s434_s19 = sadd.s32 4294967294, %s635_s17   ;;  %s635_s17 = sphi %s673_s17, %s19_s17   ;;  %s631_s16 = sphi %s671_s16, %s864_s16   ;;  %s627_s15 = sphi %s669_s15, %s863_s15   ;;  %s623_s14 = sphi %s667_s14, %s862_s14   ;;  %s619_s13 = sphi %s665_s13, %s861_s13   ;;  %s615_s12 = sphi %s663_s12, %s860_s12  }
   0x7   : > { %s31_s20 = sadd.s32 1, %s631_s16  ;;  %s40_s21 = sadd.s32 1, %s623_s14 }
   0x8   : > { %p33_p0 = scmp.ge.s32.totalorder %s31_s20, 2  ;;  %p47_p1 = scmp.ne.s32.totalorder %s623_s14, %s619_s13 }
   0x9   : > { %p48_p2 = scmp.eq.s32.totalorder %s635_s17, 0  ;;  %p53_p3 = scmp.ne.s32.totalorder %s619_s13, %s615_s12 }
   0xa   : > { %s866_s20 = smov (%p33_p0, %s31_s20), 0  ;;  %p54_p5 = scmp.eq.s32.totalorder %s433_s18, 0 }
   0xb   : > { %p704_p4 = por %p48_p2, %p47_p1  ;;  %s35_s23 = ssub.s32 %s631_s16, %s866_s20 }
   0xc   : > { %p121_p6 = scmp.eq.s32.totalorder %s433_s18, 1  ;;  %p38_p7 = scmp.eq.s32.totalorder %s35_s23, 0 }
   0xd   : > { %p710_p8 = por %p54_p5, %p53_p3  ;;  %p127_p10 = scmp.eq.s32.totalorder %s434_s19, 1 }
   0xe   : > { %p714_p9 = por %p121_p6, %p47_p1  ;;  %p462_p13 = scmp.lt.s32.totalorder %s635_s17, 2 }
   0xf   : > { %s719_s26 = scalar_select %p38_p7, %s623_s14, %s40_s21  }
  0x10   : > { %s852_s25 = scalar_select %p714_p9, 1, 0 }
  0x11   : > { %p721_p11 = por %p127_p10, %p53_p3  ;;  %s153_s28 = sand.u32 1, %s623_s14  }
  0x12   : > { %s437_s29 = sshll.u32 %s153_s28, 3  ;;  %s448_s30 = sshll.u32 %s631_s16, 7 }
  0x13   : > { %s853_s27 = scalar_select %p721_p11, 1, 0 }
  0x14   : > { %s732_s6 = scalar_lea.hbm %s845_s0, %s448_s30  ;;  %s157_s7 = scalar_lea.vmem [#allocation2], %s437_s29 }
  0x15   : > { %s167_s8 = sshll.u32 %s157_s7, 4  ;;  %p738_p0 = pnand %p462_p13, %p704_p4  ;;  %s734_s8 = int_to_ptr.vmem [resolvable:$true] %s167_s8 }
  0x16   : > { %s154_s10 = scalar_lea.sflag [#allocation3], %s153_s28  ;;  %s523_s11 = scalar_lea.hbm %s732_s6, 128 }
  0x17   : > { %p524_p3 = scmp.ne.s32.totalorder %s732_s6, %s523_s11  ;;  %p525_p5 = pneg %p738_p0 }
  0x18   : > { %s528_s21 = scalar_lea.hbm %s845_s0, 256  ;;  %p529_p4 = scmp.lt.u32.totalorder %s732_s6, %s845_s0 }
  0x19   : > { %p526_p6 = pnand %p525_p5, %p524_p3  ;;  %p530_p10 = scmp.lt.u32.totalorder %s528_s21, %s523_s11 }
  0x1a   : > { %p532_p12 = scmp.lt.u32.totalorder %s523_s11, %s732_s6 }
  0x1b   : > { %p527_p7 = pneg %p526_p6  ;;  %p531_p13 = por %p530_p10, %p529_p4 }
  0x1d   : > { %p533_p1 = por %p532_p12, %p531_p13 }
  0x1f   : > { %p534_p2 = pnand %p533_p1, %p527_p7 }
  0x21   : > { %537 = shalt.err (!%p534_p2)
}
  0x22   : > { %s538_s28 = scalar_lea.vmem %s734_s8, 128  ;;  %s637_s29 = smov [#allocation2]  }
  0x23   : > { %p539_p3 = scmp.ne.s32.totalorder %s734_s8, %s538_s28  ;;  %s543_s30 = sshll.u32 %s637_s29, 4  ;;  %s544_s30 = int_to_ptr.vmem [resolvable:$false] %s543_s30 }
  0x24   : > { %s545_s4 = scalar_lea.vmem %s544_s30, 256  ;;  %p546_p9 = scmp.lt.s32.totalorder %s734_s8, %s544_s30 }
  0x25   : > { %p541_p6 = pnand %p539_p3, %p525_p5  ;;  %p547_p4 = scmp.lt.s32.totalorder %s545_s4, %s538_s28 }
  0x27   : > { %p542_p11 = pneg %p541_p6  ;;  %p548_p10 = por %p547_p4, %p546_p9 }
  0x29   : > { %p549_p12 = pnand %p548_p10, %p542_p11 }
  0x2b   : > { %552 = shalt.err (!%p549_p12)
}
  0x2c   : > { %457 = dma.hbm_to_vmem [thread:$0]  (!%p738_p0), %s732_s6, 128, %s734_s8, %s154_s10  }
  0x2d   : > { %p855_p1 = scmp.lt.s32.totalorder %s635_s17, 3  ;;  %p856_p2 = scmp.ge.s32.totalorder %s635_s17, 1 }
  0x2f   : > { %p173_p5 = pnand %p856_p2, %p855_p1 }
  0x30   : > { %s774_s5 = sand.u32 (!%p173_p5), 1, %s619_s13  }
  0x31   : > { %176 = sbr.rel (%p173_p5) target bundleno = 220 (0xdc), region = 32  ;;  %s441_s7 = sshll.u32 (!%p173_p5), %s774_s5, 3 }
  0x32   : > { %s179_s11 = scalar_lea.sflag (!%p173_p5), [#allocation3], %s774_s5  ;;  %s182_s9 = scalar_lea.vmem (!%p173_p5), [#allocation2], %s441_s7 }
  0x38   : > { %606 = dma.done.wait (%p710_p8), %s179_s11, 128  }
  0x39   : > { %608 = vsyncadd (%p710_p8), %s179_s11, 4294967168  ;;  %v638_v0 = vmov 0   ;;  %v639_v1 = vmov 2   ;;  %v209_v2 = vld [vmem:[%s846_s1] sm:$0xf]  ;;  %v640_v3 = vmov 1   ;;  %v216_v6 = vlaneseq }
  0x3a   : > { %516 = vset.pattern.permute.xlu0 %v638_v0  ;;  %518 = vset.pattern.permute.xlu1 %v639_v1  ;;  %v641_v4 = vmov 3   ;;  %v208_v5 = vld [vmem:[%s847_s2] sm:$0xf]  ;;  %s449_s24 = sshll.u32 %s627_s15, 7  ;;  %s204_s19 = scalar_lea.vmem [#allocation5], %s441_s7 }
  0x3b   : > { %212 = vperm.xlu0 %516, %v209_v2   ;;  %265 = vperm.xlu1 %518, %v209_v2   ;;  %v217_v7 = vshrl.u32 %v216_v6, 7  ;;  %v207_v12 = vld [vmem:[%s182_s9] sm:$0xff]  ;;  %s349_s21 = sshll.u32 %s204_s19, 4  ;;  %s796_s28 = scalar_lea.hbm %s848_s3, %s449_s24  ;;  %s798_s21 = int_to_ptr.vmem [resolvable:$true] %s349_s21 }
  0x3c   : > { %v323_v52 = vcombine.high %v207_v12, %v207_v12  ;;  %s333_s29 = scalar_lea.sflag [#allocation4], %s774_s5  ;;  %s553_s30 = scalar_lea.vmem %s798_s21, 128 }
  0x3d   : > { %v218_v8 = vsub.s32 0, %v217_v7  ;;  %v222_v9 = vsub.s32 4, %v217_v7  ;;  %v244_v10 = vsub.s32 1, %v217_v7  ;;  %v248_v11 = vsub.s32 5, %v217_v7  ;;  %p554_p8 = scmp.ne.s32.totalorder %s798_s21, %s553_s30  ;;  %p857_p9 = scmp.ne.s32.totalorder %s852_s25, 0 }
  0x3e   : > { %v270_v13 = vsub.s32 2, %v217_v7  ;;  %v274_v14 = vsub.s32 6, %v217_v7  ;;  %v296_v15 = vsub.s32 3, %v217_v7  ;;  %v300_v16 = vsub.s32 7, %v217_v7  ;;  %s642_s15 = smov [#allocation5]  }
  0x3f   : > { %517 = vset.pattern.permute.xlu0 %v640_v3  ;;  %519 = vset.pattern.permute.xlu1 %v641_v4  ;;  %v219_v17 = vrot.slane %v207_v12, %v218_v8  ;;  %v223_v18 = vrot.slane %v207_v12, %v222_v9  ;;  %v245_v19 = vrot.slane %v207_v12, %v244_v10  ;;  %p555_p11 = pnand %p554_p8, %p857_p9  ;;  %s557_s4 = sshll.u32 %s642_s15, 4  ;;  %s558_s4 = int_to_ptr.vmem [resolvable:$false] %s557_s4 }
  0x40   : > { %239 = vperm.xlu0 %517, %v209_v2   ;;  %291 = vperm.xlu1 %519, %v209_v2   ;;  %v249_v20 = vrot.slane %v207_v12, %v248_v11  ;;  %v271_v21 = vrot.slane %v207_v12, %v270_v13  ;;  %v275_v22 = vrot.slane %v207_v12, %v274_v14  ;;  %s559_s7 = scalar_lea.vmem %s558_s4, 256  ;;  %p560_p7 = scmp.lt.s32.totalorder %s798_s21, %s558_s4 }
  0x41   : > { %v297_v25 = vrot.slane %v207_v12, %v296_v15  ;;  %v301_v26 = vrot.slane %v207_v12, %v300_v16  ;;  %v229_v27 = vrot.slane %v219_v17, %v218_v8  ;;  %v233_v28 = vrot.slane %v223_v18, %v218_v8  ;;  %p556_p0 = pneg %p555_p11  ;;  %p561_p13 = scmp.lt.s32.totalorder %s559_s7, %s553_s30 }
  0x42   : > { %v255_v29 = vrot.slane %v245_v19, %v244_v10  ;;  %v259_v30 = vrot.slane %v249_v20, %v244_v10  ;;  %v281_v31 = vrot.slane %v271_v21, %v270_v13  ;;  %v285_v32 = vrot.slane %v275_v22, %v270_v13 }
  0x43   : > { %v307_v33 = vrot.slane %v297_v25, %v296_v15  ;;  %v311_v34 = vrot.slane %v301_v26, %v296_v15  ;;  %p562_p3 = por %p561_p13, %p560_p7 }
  0x44   : > { %520 = vset.pattern.permute.xlu1 %v638_v0  ;;  %521 = vset.pattern.permute.xlu0 %v638_v0 }
  0x45   : > { %318 = vperm.xlu1 %520, %v208_v5   ;;  %p563_p6 = pnand %p562_p3, %p556_p0 }
  0xba   : > { %v213_v23 = vpop.permute.xlu0 %212  ;;  %v266_v24 = vpop.permute.xlu1 %265 }
  0xbb   : > { %v234_v37 = vmul.f32 %v229_v27, %v213_v23  ;;  %v235_v38 = vmul.f32 %v233_v28, %v213_v23  ;;  %v286_v41 = vmul.f32 %v281_v31, %v266_v24  ;;  %v287_v42 = vmul.f32 %v285_v32, %v266_v24 }
  0xbf   : > { %v240_v35 = vpop.permute.xlu0 %239  ;;  %v292_v36 = vpop.permute.xlu1 %291 }
  0xc0   : > { %v260_v39 = vmul.f32 %v255_v29, %v240_v35  ;;  %v261_v40 = vmul.f32 %v259_v30, %v240_v35  ;;  %v312_v45 = vmul.f32 %v307_v33, %v292_v36  ;;  %v313_v46 = vmul.f32 %v311_v34, %v292_v36 }
  0xc2   : > { %v262_v43 = vadd.f32 %v260_v39, %v234_v37  ;;  %v263_v44 = vadd.f32 %v261_v40, %v235_v38 }
  0xc4   : > { %v288_v47 = vadd.f32 %v286_v41, %v262_v43  ;;  %v289_v48 = vadd.f32 %v287_v42, %v263_v44  ;;  %v319_v49 = vpop.permute.xlu1 %318 }
  0xc6   : > { %v314_v50 = vadd.f32 %v312_v45, %v288_v47  ;;  %v315_v51 = vadd.f32 %v313_v46, %v289_v48 }
  0xc8   : > { %v321_v53 = vadd.f32 %v319_v49, %v314_v50  ;;  %v322_v54 = vadd.f32 %v319_v49, %v315_v51 }
  0xca   : > { %v325_v55 = vadd.f32 %v321_v53, %v207_v12  ;;  %v326_v56 = vadd.f32 %v323_v52, %v322_v54 }
  0xcc   : > { %v329_v57 = vcombine.low %v325_v55, %v326_v56 }
  0xce   : > { %331 = vst [vmem:[%s204_s19] sm:$0xff] %v329_v57 }
  0xcf   : > { %566 = shalt.err (!%p563_p6)
}
  0xd0   : > { %s567_s5 = scalar_lea.hbm %s796_s28, 128  ;;  %s571_s6 = scalar_lea.hbm %s848_s3, 256 }
  0xd1   : > { %p568_p4 = scmp.ne.s32.totalorder %s796_s28, %s567_s5  ;;  %p572_p1 = scmp.lt.u32.totalorder %s796_s28, %s848_s3 }
  0xd2   : > { %p573_p2 = scmp.lt.u32.totalorder %s571_s6, %s567_s5  ;;  %p575_p8 = scmp.lt.u32.totalorder %s567_s5, %s796_s28 }
  0xd3   : > { %p569_p10 = pnand %p568_p4, %p857_p9 }
  0xd4   : > { %p574_p5 = por %p573_p2, %p572_p1 }
  0xd5   : > { %p570_p12 = pneg %p569_p10 }
  0xd6   : > { %p576_p11 = por %p575_p8, %p574_p5 }
  0xd8   : > { %p577_p0 = pnand %p576_p11, %p570_p12 }
  0xda   : > { %580 = shalt.err (!%p577_p0)
}
  0xdb   : > { %452 = dma.vmem_to_hbm [thread:$0]  (%p857_p9), %s798_s21, 128, %s796_s28, %s333_s29  }
  0xdc PF: > { %s361_s18 = sand.u32 1, %s615_s12   ;;  %p858_p7 = scmp.ne.s32.totalorder %s853_s27, 0 }
  0xdd   : > { %p859_p13 = scmp.ge.s32.totalorder %s635_s17, 2  ;;  %s362_s24 = scalar_lea.sflag [#allocation4], %s361_s18 }
  0xdf   : > { %p459_p3 = pnand %p859_p13, %p858_p7 }
  0xe1   : > { %610 = dma.done.wait (!%p459_p3), %s362_s24, 128  }
  0xe2   : > { %612 = vsyncadd (!%p459_p3), %s362_s24, 4294967168  ;;  %s19_s17 = sadd.s32 1, %s635_s17   ;;  %s860_s12 = smov %s619_s13 }
  0xe3   : > { %p16_p6 = scmp.ge.s32.totalorder %s19_s17, 4   ;;  %s861_s13 = smov %s623_s14 }
  0xe4   : > { %s862_s14 = smov %s719_s26  ;;  %s863_s15 = smov %s631_s16 }
  0xe5   : > { %s864_s16 = smov %s866_s20  ;;  %18 = sbr.rel (!%p16_p6) target bundleno = 6 (0x6), region = 77 }
  0xec   :  { %367 = vsyncpa [#allocation3], 1 }
  0xed   :  { %369 = vsyncpa [#allocation3 + $0x1], 1 }
  0xee   :  { %370 = vsyncpa [#allocation4], 1 }
  0xef   :  { %372 = vsyncpa [#allocation4 + $0x1], 1 }

</bundles_post_ra>
